<compile_context>
chip_gen: v5e
topology: v5e:2x2
jax: 0.10.0
libtpu: 0.0.40
codegen_flags: <defaults>
</compile_context>

<pallas_src>
import jax
import jax.numpy as jnp
import numpy as np
from jax import lax
from jax.experimental import pallas as pl
from jax.experimental.pallas import tpu as pltpu


# ------------------------------- kernel -------------------------------------

def _hyper_lora_kernel(x_ref, w_ref, a_ref, bm_ref, bias_ref, o_ref, t_ref):
    """One (b, s-tile, out-tile, k-tile) grid step.

    x_ref   : (1, tm, tk)   input tile (compute dtype, e.g. bf16)
    w_ref   : (tn, tk)      base weight tile, PyTorch (OUT, IN) layout
    a_ref   : (1, Rp, tk)   LoRA A, (Rp, IN) layout -> lane axis = IN
    bm_ref  : (1, Rp, tn)   LoRA B, pre-scaled by 1/r, zero rows above r
    bias_ref: (1, tn)       f32
    o_ref   : (1, tm, tn)   f32 output; index map ignores k -> VMEM-resident
                            across the K sweep, used directly as accumulator
    t_ref   : (tm, Rp)      f32 scratch: x @ A^T, computed only at j == 0 and
                            reused for every out-tile j > 0
    """
    j = pl.program_id(2)
    k = pl.program_id(3)
    nk = pl.num_programs(3)

    x = x_ref[0]                     # (tm, tk)
    w = w_ref[...]                   # (tn, tk)

    # Base: x @ W^T, contracting the IN (lane) axis of both operands.  The NT
    # form maps to the MXU's native transposed-operand load (no XLU transpose).
    base = lax.dot_general(x, w, (((1,), (1,)), ((), ())),
                           preferred_element_type=jnp.float32)

    @pl.when(k == 0)
    def _():
        o_ref[0] = base

    @pl.when(k > 0)
    def _():
        o_ref[0] += base

    # LoRA first factor t = x @ A^T depends only on (b, s-tile, k): compute it
    # during the j == 0 sweep only and reuse the persistent scratch afterwards.
    @pl.when(jnp.logical_and(j == 0, k == 0))
    def _():
        t_ref[...] = jnp.zeros_like(t_ref)

    @pl.when(j == 0)
    def _():
        a = a_ref[0]                 # (Rp, tk)
        t_ref[...] += lax.dot_general(x, a, (((1,), (1,)), ((), ())),
                                      preferred_element_type=jnp.float32)

    # Finalize once per output tile: bias + tiny (K = Rp) second LoRA matmul.
    # t stays f32 here so the LoRA path does not lose mantissa to a bf16
    # round-trip of the accumulator.
    @pl.when(k == nk - 1)
    def _():
        bm = bm_ref[0].astype(jnp.float32)                      # (Rp, tn)
        lora = jnp.dot(t_ref[...], bm, preferred_element_type=jnp.float32)
        o_ref[0] = o_ref[0] + bias_ref[...] + lora


# ------------------------ tile / VMEM sizing helpers -------------------------

def _pick_tile(dim, target, aligns):
    """Largest tile <= target that divides `dim` and is a multiple of one of
    `aligns` (tried in order); falls back to the full dim."""
    if dim <= target:
        return dim
    for align in aligns:
        t = (target // align) * align
        while t >= align:
            if dim % t == 0:
                return t
            t -= align
    # NOTE: prime-ish dims fall back to the full dim; this can exceed the VMEM
    # budget (robustness hazard flagged in review, not a numerical bug).
    return dim


def _footprint_bytes(tm, tn, tk, rp, in_bytes):
    """Per-grid-step VMEM block footprint, including double-buffering."""
    blocks = (tm * tk * in_bytes        # x
              + tn * tk * in_bytes      # W
              + rp * tk * in_bytes      # A
              + rp * tn * in_bytes      # Bm
              + tn * 4                  # bias
              + tm * tn * 4)            # o (f32, resident accumulator)
    scratch = tm * rp * 4               # t = x @ A^T
    return 2 * blocks + scratch


def _vmem_capacity_bytes():
    try:
        cap = getattr(pltpu.get_tpu_info(), "vmem_capacity_bytes", None)
        if cap:
            return int(cap)
    except Exception:
        pass
    return 64 * 1024 * 1024   # v7x per-TC capacity: the safest assumption


# -------------------------------- wrapper ------------------------------------

def hyper_lora_linear_pallas(x, A_t, Bm, weight, bias, *,
                             tm=None, tn=None, tk=None,
                             compute_dtype=jnp.bfloat16,
                             vmem_budget_bytes=None):
    """Fused  out = x @ W^T + bias + (x @ A^T) @ Bm   (Bm already holds 1/r).

    x      : (B, S, IN)
    A_t    : (B, Rp, IN)   lane-dense LoRA A (zero-padded rank rows allowed)
    Bm     : (B, Rp, OUT)  LoRA B, pre-scaled, zero-padded rank rows allowed
    weight : (OUT, IN)     PyTorch layout (no wrapper transpose)
    bias   : (OUT,) or None
    Returns an f32 (B, S, OUT) array (caller may cast down).
    """
    B, S, IN = x.shape
    OUT, IN_w = weight.shape
    assert IN_w == IN
    Rp = A_t.shape[1]
    assert Bm.shape == (B, Rp, OUT)
    assert Rp % 8 == 0, "pad the LoRA rank to a multiple of 8 (ideally 128)"

    in_bytes = jnp.dtype(compute_dtype).itemsize

    # VMEM: never request more than ~56 MiB of scoped VMEM -- stays inside
    # v7x's 64 MiB/TC with compiler headroom, and is far above the v5e/v6e
    # defaults.  The block-footprint budget is 80% of the limit.
    cap = _vmem_capacity_bytes()
    vmem_limit = min(int(0.85 * cap), 56 * 1024 * 1024)
    if vmem_budget_bytes is None:
        vmem_budget_bytes = int(0.8 * vmem_limit)

    # Tile selection: tn/tk multiples of 256 keep full MXU passes on v6e/v7x
    # (2x256x256); 128 is the v5e-sufficient fallback.  tm only needs 8.
    tm = tm if tm is not None else _pick_tile(S, 256, (8,))
    tn = tn if tn is not None else _pick_tile(OUT, 512, (256, 128))
    if tk is None:
        if _footprint_bytes(tm, tn, IN, Rp, in_bytes) <= vmem_budget_bytes:
            # Collapsed K: x block index ignores j -> x DMA'd once per
            # (b, s-tile); no per-K-step accumulator round-trips.
            tk = IN
        else:
            tk = _pick_tile(IN, 2048, (256, 128))
            while (tk > 256 and
                   _footprint_bytes(tm, tn, tk, Rp, in_bytes) > vmem_budget_bytes):
                nxt = _pick_tile(IN, tk // 2, (256, 128))
                if nxt == tk:
                    break
                tk = nxt

    assert S % tm == 0 and OUT % tn == 0 and IN % tk == 0
    grid = (B, S // tm, OUT // tn, IN // tk)

    if bias is None:
        bias = jnp.zeros((OUT,), jnp.float32)
    bias2 = bias.astype(jnp.float32).reshape(1, OUT)

    xc = x.astype(compute_dtype)
    wc = weight.astype(compute_dtype)
    ac = A_t.astype(compute_dtype)
    bc = Bm.astype(compute_dtype)

    return pl.pallas_call(
        _hyper_lora_kernel,
        out_shape=jax.ShapeDtypeStruct((B, S, OUT), jnp.float32),
        grid_spec=pltpu.PrefetchScalarGridSpec(
            num_scalar_prefetch=0,
            grid=grid,
            in_specs=[
                pl.BlockSpec((1, tm, tk), lambda b, i, j, k: (b, i, k)),   # x
                # TODO(synk): if the W stream is DMA-exposed at production
                # sizes, add pipeline_mode=pl.Buffered(3) here (costs VMEM).
                pl.BlockSpec((tn, tk), lambda b, i, j, k: (j, k)),         # W (OUT,IN)
                pl.BlockSpec((1, Rp, tk), lambda b, i, j, k: (b, 0, k)),   # A (Rp,IN)
                pl.BlockSpec((1, Rp, tn), lambda b, i, j, k: (b, 0, j)),   # Bm (Rp,OUT)
                pl.BlockSpec((1, tn), lambda b, i, j, k: (0, j)),          # bias
            ],
            out_specs=pl.BlockSpec((1, tm, tn), lambda b, i, j, k: (b, i, j)),
            scratch_shapes=[
                pltpu.VMEM((tm, Rp), jnp.float32),   # t = x @ A^T (carried over j)
            ]),
        compiler_params=pltpu.CompilerParams(
            # j and k carry the t scratch / resident output block across steps,
            # so they must not be megacore-split; b, i shard across cores.
            dimension_semantics=("parallel", "parallel", "arbitrary", "arbitrary"),
            vmem_limit_bytes=vmem_limit),
    )(xc, wc, ac, bc, bias2)


# -------------------------- module-level glue --------------------------------

def prepare_params(raw, *, compute_dtype=jnp.bfloat16):
    """One-time parameter preprocessing (no per-forward transposes / scales):
      * hyper_A rows re-ordered so the hyper matmul emits A directly in the
        kernel's lane-dense (B, Rp, IN) layout,
      * 1/r folded into hyper_B,
      * both zero-padded from r to Rp (multiple of 128) rank rows -> lane-dense
        t scratch, full-depth finalize matmul, numerically identical,
      * base weight pre-cast to the compute dtype.
    """
    r = raw["r"]
    OUT, IN = raw["weight"].shape
    ns = raw["task_embs"].shape[1]
    Rp = ((r + 127) // 128) * 128

    hyper_A = raw["hyper_A"]                                  # (r*IN, ns), rows=(IN, r)
    hyper_A_t = jnp.transpose(hyper_A.reshape(IN, r, ns), (1, 0, 2))   # (r, IN, ns)
    hyper_A_t = jnp.concatenate(
        [hyper_A_t, jnp.zeros((Rp - r, IN, ns), hyper_A.dtype)], axis=0)
    hyper_A_t = hyper_A_t.reshape(Rp * IN, ns)

    hyper_B_s = (raw["hyper_B"] * (1.0 / r)).reshape(r, OUT, ns)       # rows=(r, OUT)
    hyper_B_s = jnp.concatenate(
        [hyper_B_s, jnp.zeros((Rp - r, OUT, ns), raw["hyper_B"].dtype)], axis=0)
    hyper_B_s = hyper_B_s.reshape(Rp * OUT, ns)

    p = dict(raw)
    p.update(
        Rp=Rp,
        hyper_A_t=hyper_A_t,
        hyper_B_scaled=hyper_B_s,
        weight_c=raw["weight"].astype(compute_dtype),
        compute_dtype=compute_dtype,
    )
    return p


def hyper_lora_forward(params, x, task_ids, **tile_kwargs):
    """Full module forward. Hypernetwork (tiny MLP on n_skills) is plain-JAX
    glue; the per-token matmuls run in the Pallas kernel."""
    B, S, IN = x.shape
    OUT = params["weight"].shape[0]
    Rp = params["Rp"]

    # repeat_interleave of task_ids to match batch
    T = task_ids.shape[0]
    assert B % T == 0
    repeats = B // T
    if repeats > 1:
        task_ids = jnp.repeat(task_ids, repeats, axis=0)

    # task embedding + 2-layer projection MLP (tiny -> plain JAX)
    z = params["task_embs"][task_ids]                                   # (B, n_skills)
    z = jnp.maximum(z @ params["proj_w1"].T + params["proj_b1"], 0.0)
    z = z @ params["proj_w2"].T + params["proj_b2"]                     # (B, n_skills)

    # hypernetwork-generated LoRA factors, already in kernel layout:
    # A_t (B, Rp, IN) lane-dense, Bm (B, Rp, OUT) pre-scaled by 1/r.
    A_t = (z @ params["hyper_A_t"].T).reshape(B, Rp, IN)
    Bm = (z @ params["hyper_B_scaled"].T).reshape(B, Rp, OUT)

    out = hyper_lora_linear_pallas(
        x, A_t, Bm, params["weight_c"], params["bias"],
        compute_dtype=params["compute_dtype"], **tile_kwargs)
    return out.astype(x.dtype)


# ------------------------------ reference ------------------------------------

def _reference(raw, x, task_ids):
    B, S, IN = x.shape
    r = raw["r"]
    OUT = raw["weight"].shape[0]
    T = task_ids.shape[0]
    repeats = B // T
    if repeats > 1:
        task_ids = jnp.repeat(task_ids, repeats, axis=0)
    z = raw["task_embs"][task_ids]
    z = jnp.maximum(z @ raw["proj_w1"].T + raw["proj_b1"], 0.0)
    z = z @ raw["proj_w2"].T + raw["proj_b2"]
    A = (z @ raw["hyper_A"].T).reshape(B, IN, r)
    Bm = (z @ raw["hyper_B"].T).reshape(B, r, OUT)
    base = jnp.einsum("bsi,oi->bso", x, raw["weight"]) + raw["bias"]
    lora = jnp.einsum("bsr,bro->bso", jnp.einsum("bsi,bir->bsr", x, A), Bm)
    return base + lora * (1.0 / r)


if __name__ == "__main__":
    # Small shapes consistent with the module, big enough to exercise both the
    # tiled grid and the collapsed-K / bf16 production path.
    n_tasks, n_skills, r = 4, 8, 16
    B, S, IN, OUT = 4, 16, 256, 256

    key = jax.random.PRNGKey(0)
    ks = jax.random.split(key, 10)

    raw = {
        "r": r,
        "task_embs": jax.random.normal(ks[0], (n_tasks, n_skills), jnp.float32),
        "proj_w1": jax.random.normal(ks[1], (n_skills, n_skills), jnp.float32) * 0.3,
        "proj_b1": jax.random.normal(ks[2], (n_skills,), jnp.float32) * 0.1,
        "proj_w2": jax.random.normal(ks[3], (n_skills, n_skills), jnp.float32) * 0.3,
        "proj_b2": jax.random.normal(ks[4], (n_skills,), jnp.float32) * 0.1,
        "weight": jax.random.normal(ks[5], (OUT, IN), jnp.float32) * 0.1,
        "bias": jax.random.normal(ks[6], (OUT,), jnp.float32) * 0.1,
        "hyper_A": jax.random.normal(ks[7], (r * IN, n_skills), jnp.float32) * 0.05,
        # reset_parameters() zeroes this in PyTorch; small randoms exercise the path
        "hyper_B": jax.random.normal(ks[8], (OUT * r, n_skills), jnp.float32) * 0.05,
    }

    x = jax.random.normal(ks[9], (B, S, IN), jnp.float32)
    task_ids = jnp.array([0, 2], dtype=jnp.int32)   # B % len(task_ids) == 0 -> repeats=2

    ref = _reference(raw, x, task_ids)

    # 1) f32 compute with forced small tiles -> grid (4, 2, 2, 2): exercises the
    #    K accumulation into the resident output block and the j==0 t reuse.
    p_f32 = prepare_params(raw, compute_dtype=jnp.float32)
    out_f32 = hyper_lora_forward(p_f32, x, task_ids, tm=8, tn=128, tk=128)
    out_f32 = jax.block_until_ready(out_f32)
    assert out_f32.shape == (B, S, OUT)
    np.testing.assert_allclose(np.asarray(out_f32), np.asarray(ref),
                               rtol=1e-4, atol=1e-4)

    # 2) default (production) path: bf16 MXU inputs, auto tile selection
    #    -> collapsed K (tk = IN), f32 accumulation in the output block.
    p_bf16 = prepare_params(raw, compute_dtype=jnp.bfloat16)
    out_bf16 = hyper_lora_forward(p_bf16, x, task_ids)
    out_bf16 = jax.block_until_ready(out_bf16)
    assert out_bf16.shape == (B, S, OUT)
    np.testing.assert_allclose(np.asarray(out_bf16), np.asarray(ref),
                               rtol=3e-2, atol=3e-2)

    print("KERNEL_OK")
</pallas_src>

<mosaic_0001>
module attributes {stable_mosaic.version = 11 : i64} {
  func.func @_hyper_lora_kernel(%arg0: i32, %arg1: i32, %arg2: i32, %arg3: i32, %arg4: memref<1x8x128xf32, #tpu.memory_space<vmem>>, %arg5: memref<128x128xf32, #tpu.memory_space<vmem>>, %arg6: memref<1x128x128xf32, #tpu.memory_space<vmem>>, %arg7: memref<1x128x128xf32, #tpu.memory_space<vmem>>, %arg8: memref<1x128xf32, #tpu.memory_space<vmem>>, %arg9: memref<1x8x128xf32, #tpu.memory_space<vmem>>, %arg10: memref<8x128xf32, #tpu.memory_space<vmem>>) attributes {dimension_semantics = [#tpu.dimension_semantics<parallel>, #tpu.dimension_semantics<parallel>, #tpu.dimension_semantics<arbitrary>, #tpu.dimension_semantics<arbitrary>], iteration_bounds = array<i64: 4, 2, 2, 2>, scalar_prefetch = 0 : i64, scratch_operands = 1 : i64, tpu.core_type = #tpu.core_type<tc>, window_params = [{transform_indices = @transform_0, window_bounds = array<i64: 1, 8, 128>}, {transform_indices = @transform_1, window_bounds = array<i64: 128, 128>}, {transform_indices = @transform_2, window_bounds = array<i64: 1, 128, 128>}, {transform_indices = @transform_3, window_bounds = array<i64: 1, 128, 128>}, {transform_indices = @transform_4, window_bounds = array<i64: 1, 128>}, {transform_indices = @transform_5, window_bounds = array<i64: 1, 8, 128>}]} {
    %c0 = arith.constant 0 : index
    %c0_0 = arith.constant 0 : index
    %c0_1 = arith.constant 0 : index
    %0 = vector.load %arg4[%c0, %c0_0, %c0_1] : memref<1x8x128xf32, #tpu.memory_space<vmem>>, vector<1x8x128xf32>
    %1 = vector.shape_cast %0 : vector<1x8x128xf32> to vector<8x128xf32>
    %c0_2 = arith.constant 0 : index
    %c0_3 = arith.constant 0 : index
    %2 = vector.load %arg5[%c0_2, %c0_3] : memref<128x128xf32, #tpu.memory_space<vmem>>, vector<128x128xf32>
    %cst = arith.constant dense<0.000000e+00> : vector<8x128xf32>
    %3 = tpu.matmul %1, %2, %cst {dimension_numbers = #tpu.dot_dimension_numbers<[1], [1], [0], [0], [0, 0, 1, 0], [], []>} : vector<8x128xf32>, vector<128x128xf32>, vector<8x128xf32> -> vector<8x128xf32>
    %c0_i32 = arith.constant 0 : i32
    %4 = arith.cmpi eq, %arg3, %c0_i32 : i32
    %5 = arith.extui %4 : i1 to i32
    %c0_i32_4 = arith.constant 0 : i32
    %6 = arith.cmpi ne, %5, %c0_i32_4 : i32
    scf.if %6 {
      %c0_13 = arith.constant 0 : index
      %c0_14 = arith.constant 0 : index
      %c0_15 = arith.constant 0 : index
      %21 = vector.load %arg9[%c0_13, %c0_14, %c0_15] : memref<1x8x128xf32, #tpu.memory_space<vmem>>, vector<1x8x128xf32>
      %22 = vector.shape_cast %21 : vector<1x8x128xf32> to vector<8x128xf32>
      %23 = vector.shape_cast %3 : vector<8x128xf32> to vector<1x8x128xf32>
      tpu.vector_store %arg9[%c0_13, %c0_14, %c0_15], %23 {strides = array<i32>} : memref<1x8x128xf32, #tpu.memory_space<vmem>>, vector<1x8x128xf32>,
    } else {
    }
    %c0_i32_5 = arith.constant 0 : i32
    %7 = arith.cmpi sgt, %arg3, %c0_i32_5 : i32
    %8 = arith.extui %7 : i1 to i32
    %c0_i32_6 = arith.constant 0 : i32
    %9 = arith.cmpi ne, %8, %c0_i32_6 : i32
    scf.if %9 {
      %c0_13 = arith.constant 0 : index
      %c0_14 = arith.constant 0 : index
      %c0_15 = arith.constant 0 : index
      %21 = vector.load %arg9[%c0_13, %c0_14, %c0_15] : memref<1x8x128xf32, #tpu.memory_space<vmem>>, vector<1x8x128xf32>
      %22 = vector.shape_cast %21 : vector<1x8x128xf32> to vector<8x128xf32>
      %23 = arith.addf %22, %3 : vector<8x128xf32>
      %c0_16 = arith.constant 0 : index
      %c0_17 = arith.constant 0 : index
      %c0_18 = arith.constant 0 : index
      %24 = vector.load %arg9[%c0_16, %c0_17, %c0_18] : memref<1x8x128xf32, #tpu.memory_space<vmem>>, vector<1x8x128xf32>
      %25 = vector.shape_cast %24 : vector<1x8x128xf32> to vector<8x128xf32>
      %26 = vector.shape_cast %23 : vector<8x128xf32> to vector<1x8x128xf32>
      tpu.vector_store %arg9[%c0_16, %c0_17, %c0_18], %26 {strides = array<i32>} : memref<1x8x128xf32, #tpu.memory_space<vmem>>, vector<1x8x128xf32>,
    } else {
    }
    %c0_i32_7 = arith.constant 0 : i32
    %10 = arith.cmpi eq, %arg2, %c0_i32_7 : i32
    %c0_i32_8 = arith.constant 0 : i32
    %11 = arith.cmpi eq, %arg3, %c0_i32_8 : i32
    %12 = arith.andi %10, %11 : i1
    %13 = arith.extui %12 : i1 to i32
    %c0_i32_9 = arith.constant 0 : i32
    %14 = arith.cmpi ne, %13, %c0_i32_9 : i32
    scf.if %14 {
      %cst_13 = arith.constant 0.000000e+00 : f32
      %21 = vector.broadcast %cst_13 : f32 to vector<8x128xf32>
      %c0_14 = arith.constant 0 : index
      %c0_15 = arith.constant 0 : index
      %22 = vector.load %arg10[%c0_14, %c0_15] : memref<8x128xf32, #tpu.memory_space<vmem>>, vector<8x128xf32>
      tpu.vector_store %arg10[%c0_14, %c0_15], %21 {strides = array<i32>} : memref<8x128xf32, #tpu.memory_space<vmem>>, vector<8x128xf32>,
    } else {
    }
    %c0_i32_10 = arith.constant 0 : i32
    %15 = arith.cmpi eq, %arg2, %c0_i32_10 : i32
    %16 = arith.extui %15 : i1 to i32
    %c0_i32_11 = arith.constant 0 : i32
    %17 = arith.cmpi ne, %16, %c0_i32_11 : i32
    scf.if %17 {
      %c0_13 = arith.constant 0 : index
      %c0_14 = arith.constant 0 : index
      %c0_15 = arith.constant 0 : index
      %21 = vector.load %arg6[%c0_13, %c0_14, %c0_15] : memref<1x128x128xf32, #tpu.memory_space<vmem>>, vector<1x128x128xf32>
      %22 = vector.shape_cast %21 : vector<1x128x128xf32> to vector<128x128xf32>
      %c0_16 = arith.constant 0 : index
      %c0_17 = arith.constant 0 : index
      %23 = vector.load %arg10[%c0_16, %c0_17] : memref<8x128xf32, #tpu.memory_space<vmem>>, vector<8x128xf32>
      %cst_18 = arith.constant dense<0.000000e+00> : vector<8x128xf32>
      %24 = tpu.matmul %1, %22, %cst_18 {dimension_numbers = #tpu.dot_dimension_numbers<[1], [1], [0], [0], [0, 0, 1, 0], [], []>} : vector<8x128xf32>, vector<128x128xf32>, vector<8x128xf32> -> vector<8x128xf32>
      %25 = arith.addf %23, %24 : vector<8x128xf32>
      %c0_19 = arith.constant 0 : index
      %c0_20 = arith.constant 0 : index
      %26 = vector.load %arg10[%c0_19, %c0_20] : memref<8x128xf32, #tpu.memory_space<vmem>>, vector<8x128xf32>
      tpu.vector_store %arg10[%c0_19, %c0_20], %25 {strides = array<i32>} : memref<8x128xf32, #tpu.memory_space<vmem>>, vector<8x128xf32>,
    } else {
    }
    %c1_i32 = arith.constant 1 : i32
    %18 = arith.cmpi eq, %arg3, %c1_i32 : i32
    %19 = arith.extui %18 : i1 to i32
    %c0_i32_12 = arith.constant 0 : i32
    %20 = arith.cmpi ne, %19, %c0_i32_12 : i32
    scf.if %20 {
      %c0_13 = arith.constant 0 : index
      %c0_14 = arith.constant 0 : index
      %c0_15 = arith.constant 0 : index
      %21 = vector.load %arg7[%c0_13, %c0_14, %c0_15] : memref<1x128x128xf32, #tpu.memory_space<vmem>>, vector<1x128x128xf32>
      %22 = vector.shape_cast %21 : vector<1x128x128xf32> to vector<128x128xf32>
      %c0_16 = arith.constant 0 : index
      %c0_17 = arith.constant 0 : index
      %23 = vector.load %arg10[%c0_16, %c0_17] : memref<8x128xf32, #tpu.memory_space<vmem>>, vector<8x128xf32>
      %cst_18 = arith.constant dense<0.000000e+00> : vector<8x128xf32>
      %24 = tpu.matmul %23, %22, %cst_18 {dimension_numbers = #tpu.dot_dimension_numbers<[1], [0], [0], [1], [0, 0, 1, 1], [], []>} : vector<8x128xf32>, vector<128x128xf32>, vector<8x128xf32> -> vector<8x128xf32>
      %c0_19 = arith.constant 0 : index
      %c0_20 = arith.constant 0 : index
      %c0_21 = arith.constant 0 : index
      %25 = vector.load %arg9[%c0_19, %c0_20, %c0_21] : memref<1x8x128xf32, #tpu.memory_space<vmem>>, vector<1x8x128xf32>
      %26 = vector.shape_cast %25 : vector<1x8x128xf32> to vector<8x128xf32>
      %c0_22 = arith.constant 0 : index
      %c0_23 = arith.constant 0 : index
      %27 = vector.load %arg8[%c0_22, %c0_23] : memref<1x128xf32, #tpu.memory_space<vmem>>, vector<1x128xf32>
      %28 = vector.broadcast %27 : vector<1x128xf32> to vector<8x128xf32>
      %29 = arith.addf %26, %28 : vector<8x128xf32>
      %30 = arith.addf %29, %24 : vector<8x128xf32>
      %c0_24 = arith.constant 0 : index
      %c0_25 = arith.constant 0 : index
      %c0_26 = arith.constant 0 : index
      %31 = vector.load %arg9[%c0_24, %c0_25, %c0_26] : memref<1x8x128xf32, #tpu.memory_space<vmem>>, vector<1x8x128xf32>
      %32 = vector.shape_cast %31 : vector<1x8x128xf32> to vector<8x128xf32>
      %33 = vector.shape_cast %30 : vector<8x128xf32> to vector<1x8x128xf32>
      tpu.vector_store %arg9[%c0_24, %c0_25, %c0_26], %33 {strides = array<i32>} : memref<1x8x128xf32, #tpu.memory_space<vmem>>, vector<1x8x128xf32>,
    } else {
    }
    return
  }
  func.func @transform_0(%arg0: i32, %arg1: i32, %arg2: i32, %arg3: i32) -> (i32, i32, i32) {
    %c0_i32 = arith.constant 0 : i32
    return %arg0, %arg1, %arg3 : i32, i32, i32
  }
  func.func @transform_1(%arg0: i32, %arg1: i32, %arg2: i32, %arg3: i32) -> (i32, i32) {
    %c0_i32 = arith.constant 0 : i32
    return %arg2, %arg3 : i32, i32
  }
  func.func @transform_2(%arg0: i32, %arg1: i32, %arg2: i32, %arg3: i32) -> (i32, i32, i32) {
    %c0_i32 = arith.constant 0 : i32
    %c0_i32_0 = arith.constant 0 : i32
    return %arg0, %c0_i32, %arg3 : i32, i32, i32
  }
  func.func @transform_3(%arg0: i32, %arg1: i32, %arg2: i32, %arg3: i32) -> (i32, i32, i32) {
    %c0_i32 = arith.constant 0 : i32
    %c0_i32_0 = arith.constant 0 : i32
    return %arg0, %c0_i32, %arg2 : i32, i32, i32
  }
  func.func @transform_4(%arg0: i32, %arg1: i32, %arg2: i32, %arg3: i32) -> (i32, i32) {
    %c0_i32 = arith.constant 0 : i32
    %c0_i32_0 = arith.constant 0 : i32
    return %c0_i32, %arg2 : i32, i32
  }
  func.func @transform_5(%arg0: i32, %arg1: i32, %arg2: i32, %arg3: i32) -> (i32, i32, i32) {
    %c0_i32 = arith.constant 0 : i32
    return %arg0, %arg1, %arg2 : i32, i32, i32
  }
}

</mosaic_0001>

<bundles_post_ra>
// kernel: tpu_custom_call.1
= control target key start
LH: loop header
LB: loop body
LE: loop exit
PB: predicated region body
PF: predicated region fallthrough
CT: control target
= control target key end

     0   :  { %s1971_s0 = inlined_call_operand.hbm [shape: f32[4,16,256], index: 0, kind: input, shape index: {}]   ;;  %s1972_s1 = inlined_call_operand.hbm [shape: f32[256,256], index: 1, kind: input, shape index: {}]   ;;  %s1973_s2 = inlined_call_operand.hbm [shape: f32[4,128,256], index: 2, kind: input, shape index: {}]   ;;  %s1974_s3 = inlined_call_operand.hbm [shape: f32[4,128,256], index: 3, kind: input, shape index: {}]   ;;  %s1975_s4 = inlined_call_operand.vmem [shape: f32[1,256], index: 4, kind: input, shape index: {}]   ;;  %s1976_s5 = inlined_call_operand.hbm [shape: f32[4,16,256], index: 5, kind: output, shape index: {}]  }
   0x1   :  { %2008 = sst [smem:[#allocation42_spill]] %s1971_s0 }
   0x2   :  { %2009 = sst [smem:[#allocation43_spill]] %s1972_s1 }
   0x3   :  { %2010 = sst [smem:[#allocation44_spill]] %s1973_s2 }
   0x4   :  { %2011 = sst [smem:[#allocation45_spill]] %s1974_s3 }
   0x5   :  { %2012 = sst [smem:[#allocation46_spill]] %s1975_s4 }
   0x6   :  { %2013 = sst [smem:[#allocation47_spill]] %s1976_s5 }
   0x7   :  { %10 = vsyncpa [#allocation4], 0 }
   0x8   :  { %12 = vsyncpa [#allocation4 + $0x1], 0 }
   0x9   :  { %13 = vsyncpa [#allocation7], 0 }
   0xa   :  { %15 = vsyncpa [#allocation7 + $0x1], 0 }
   0xb   :  { %16 = vsyncpa [#allocation10], 0 }
   0xc   :  { %18 = vsyncpa [#allocation10 + $0x1], 0 }
   0xd   :  { %19 = vsyncpa [#allocation5], 0 }
   0xe   :  { %21 = vsyncpa [#allocation5 + $0x1], 0  ;;  %s1431_s18 = smov 0   ;;  %s1433_s19 = smov 0  }
   0xf   :  { %s1435_s20 = smov 0   ;;  %s1437_s21 = smov 0  }
  0x10   :  { %s1439_s22 = smov 0   ;;  %s1441_s23 = smov 0  }
  0x11   :  { %s1443_s24 = smov 0   ;;  %s1445_s25 = smov 0  }
  0x12   :  { %s1447_s26 = smov 0   ;;  %s1449_s27 = smov 0  }
  0x13   :  { %s1451_s28 = smov 0   ;;  %s1453_s29 = smov 0  }
  0x14   :  { %s1455_s30 = smov 0   ;;  %s1457_s6 = smov 0  }
  0x15   :  { %s1459_s7 = smov 0   ;;  %s1461_s8 = smov 0  }
  0x16   :  { %s1463_s9 = smov 0   ;;  %s1465_s10 = smov 0  }
  0x17   :  { %s1467_s11 = smov 0   ;;  %s1469_s12 = smov 0  }
  0x18   :  { %s1471_s13 = smov 0   ;;  %s1473_s14 = smov 0  }
  0x19   :  { %s1475_s15 = smov 0   ;;  %s1477_s16 = smov 0  }
  0x1a LB: > { %2014 = sst [smem:[#allocation17_spill]] %s1315_s21  ;;  %p2001_p0 = scmp.eq.s32.totalorder %s1395_s16, 0  ;;  %s1395_s16 = sphi %s1477_s16, %s27_s16   ;;  %s1391_s15 = sphi %s1475_s15, %s2120_s15   ;;  %s1387_s14 = sphi %s1473_s14, %s2119_s14   ;;  %s1383_s13 = sphi %s1471_s13, %s2118_s13   ;;  %s1379_s12 = sphi %s1469_s12, %s2117_s12   ;;  %s1375_s11 = sphi %s1467_s11, %s2105_s11   ;;  %s1371_s10 = sphi %s1465_s10, %s2103_s10   ;;  %s1367_s9 = sphi %s1463_s9, %s2116_s9   ;;  %s1363_s8 = sphi %s1461_s8, %s2115_s8   ;;  %s1359_s7 = sphi %s1459_s7, %s2100_s7   ;;  %s1355_s6 = sphi %s1457_s6, %s2099_s6   ;;  %s1351_s30 = sphi %s1455_s30, %s2114_s30   ;;  %s1347_s29 = sphi %s1453_s29, %s2097_s29   ;;  %s1343_s28 = sphi %s1451_s28, %s2096_s28   ;;  %s1339_s27 = sphi %s1449_s27, %s2095_s27   ;;  %s1335_s26 = sphi %s1447_s26, %s2094_s26   ;;  %s1331_s25 = sphi %s1445_s25, %s2112_s25   ;;  %s1327_s24 = sphi %s1443_s24, %s2110_s24   ;;  %s1323_s23 = sphi %s1441_s23, %s2108_s23   ;;  %s1319_s22 = sphi %s1439_s22, %s2092_s22   ;;  %s1315_s21 = sphi %s1437_s21, %s2091_s21   ;;  %s1311_s20 = sphi %s1435_s20, %s2104_s20   ;;  %s1307_s19 = sphi %s1433_s19, %s2102_s19   ;;  %s1303_s18 = sphi %s1431_s18, %s2101_s18  }
  0x1b   : > { %2015 = sst [smem:[#allocation18_spill]] %s1319_s22  ;;  %p99_p1 = scmp.ne.s32.totalorder %s1347_s29, %s1343_s28 }
  0x1c   : > { %2016 = sst [smem:[#allocation19_spill]] %s1323_s23  ;;  %p105_p2 = scmp.ne.s32.totalorder %s1343_s28, %s1339_s27 }
  0x1d   : > { %2017 = sst [smem:[#allocation20_spill]] %s1335_s26  ;;  %p2002_p3 = scmp.lt.s32.totalorder %s1395_s16, 32 }
  0x1e   : > { %2018 = sst [smem:[#allocation21_spill]] %s1343_s28  ;;  %p101_p4 = por %p99_p1, %p2001_p0 }
  0x1f   : > { %2019 = sst [smem:[#allocation22_spill]] %s1347_s29  ;;  %s264_s5 = sand.u32 1, %s1395_s16  }
  0x20   : > { %2020 = sst [smem:[#allocation23_spill]] %s1355_s6  ;;  %p825_p5 = pnand %p2002_p3, %p101_p4 }
  0x21   : > { %2021 = sst [smem:[#allocation24_spill]] %s1359_s7  ;;  %p794_p6 = scmp.ge.s32.totalorder %s1395_s16, 1 }
  0x22   : > { %2022 = sst [smem:[#allocation25_spill]] %s1363_s8  ;;  %s810_s8 = sshll.u32 %s1383_s13, 5 }
  0x23   : > { %2023 = sst [smem:[#allocation26_spill]] %s1367_s9  ;;  %s273_s4 = sadd.s32 %s1379_s12, %s810_s8 }
  0x24   : > { %2024 = sst [smem:[#allocation27_spill]] %s1371_s10  ;;  %s787_s9 = sshll.u32 %s273_s4, 3 }
  0x25   : > { %2025 = sst [smem:[#allocation28_spill]] %s1375_s11  ;;  %s266_s11 = sand.u32 1, %s1347_s29  }
  0x26   : > { %2026 = sst [smem:[#allocation29_spill]] %s1387_s14  ;;  %s784_s10 = sshll.u32 %s266_s11, 7 }
  0x27   : > { %2027 = sst [smem:[#allocation30_spill]] %s1391_s15  ;;  %s268_s3 = scalar_lea.vmem [#allocation6], %s784_s10 }
  0x28   : > { %s278_s2 = sshll.u32 %s268_s3, 4  ;;  %s2028_s1 = sld [smem:[#allocation43_spill]]  ;;  %s279_s2 = int_to_ptr.vmem [resolvable:$true] %s278_s2 }
  0x29   : > { %s1570_s4 = scalar_lea.sflag [#allocation7], %s264_s5  ;;  %s1982_s3 = smov 256  }
  0x2a   : > { %s1984_s8 = smov 128   ;;  %s1986_s21 = smov 8  }
  0x2b   : > { %p338_p7 = scmp.lt.s32.totalorder %s1395_s16, 33  ;;  %s1582_s5 = sadd.s32 4294967295, %s1395_s16  }
  0x2c   : > { %s42_s10 = sadd.s32 1, %s1379_s12  ;;  %s45_s11 = sadd.s32 1, %s1383_s13 }
  0x2d   : > { %p1577_p8 = pnand %p794_p6, %p338_p7  ;;  %p43_p9 = scmp.ge.s32.totalorder %s42_s10, 2 }
  0x2e   : > { %s275_s22 = scalar_lea.hbm %s2028_s1, %s787_s9  ;;  %s49_s17 = sadd.s32 1, %s1387_s14 }
  0x2f   : > { %s276_s23 = sshll.u32 %s275_s22, 4  ;;  %s2122_s10 = smov (%p43_p9, %s42_s10), 0  ;;  %s277_s23 = int_to_ptr.hbm [resolvable:$true] %s276_s23 }
  0x30   : > { %827 = dma.hbm_to_vmem [thread:$0]  (!%p825_p5), %s277_s23, 2048, %s279_s2, %s1570_s4, %s1982_s3, %s1984_s8, %s1986_s21  }
  0x31   : > { %s2029_s22 = scalar_select %p1577_p8, 1, 0 }
  0x32   : > { %s53_s2 = sadd.s32 1, %s1391_s15  ;;  %2031 = sst [smem:[#allocation32_spill]] %s2122_s10 }
  0x33   : > { %2030 = sst [smem:[#allocation31_spill]] %s2029_s22  ;;  %s2124_s11 = smov (!%p43_p9, %s45_s11), %s1383_s13 }
  0x34   : > { %s1595_s3 = ssub.s32 %s1379_s12, %s2122_s10  ;;  %p71_p10 = scmp.ne.s32.totalorder %s1359_s7, %s1355_s6 }
  0x35   : > { %p47_p11 = scmp.ge.s32.totalorder %s2124_s11, 2  ;;  %p77_p12 = scmp.ne.s32.totalorder %s1355_s6, %s1351_s30 }
  0x36   : > { %p1603_p13 = por %p2001_p0, %p71_p10  ;;  %p2000_p1 = scmp.eq.s32.totalorder %s1582_s5, 0 }
  0x37   : > { %s2126_s11 = smov (%p47_p11, %s2124_s11), 0  ;;  %s2128_s17 = smov (!%p47_p11, %s49_s17), %s1387_s14 }
  0x38   : > { %2033 = sst [smem:[#allocation33_spill]] %s2126_s11  ;;  %p1613_p4 = por %p2000_p1, %p77_p12 }
  0x39   : > { %s87_s21 = ssub.s32 %s1383_s13, %s2126_s11  ;;  %p51_p5 = scmp.ge.s32.totalorder %s2128_s17, 2 }
  0x3a   : > { %s2034_s30 = scalar_select %p1613_p4, 1, 0 }
  0x3b   : > { %s89_s23 = sor.u32 %s87_s21, %s1595_s3  ;;  %p1625_p7 = por %p105_p2, %p2000_p1 }
  0x3c   : > { %2035 = sst [smem:[#allocation34_spill]] %s2034_s30  ;;  %p90_p6 = scmp.eq.s32.totalorder %s89_s23, 0 }
  0x3d   : > { %s2036_s9 = scalar_select %p1625_p7, 1, 0 }
  0x3e   : > { %s2130_s17 = smov (%p51_p5, %s2128_s17), 0  ;;  %s2132_s2 = smov (!%p51_p5, %s53_s2), %s1391_s15 }
  0x3f   : > { %2037 = sst [smem:[#allocation35_spill]] %s2036_s9  ;;  %s58_s1 = ssub.s32 %s1387_s14, %s2130_s17 }
  0x40   : > { %2038 = sst [smem:[#allocation36_spill]] %s2130_s17  ;;  %s204_s10 = sadd.s32 1, %s1311_s20 }
  0x41   : > { %p55_p9 = scmp.ge.s32.totalorder %s2132_s2, 4  ;;  %p214_p10 = scmp.ne.s32.totalorder %s1311_s20, %s1307_s19 }
  0x42   : > { %s2039_s11 = sadd.s32 1, %s1347_s29  ;;  %p215_p2 = scmp.eq.s32.totalorder %s1582_s5, 31 }
  0x43   : > { %s1640_s30 = scalar_select %p90_p6, %s1347_s29, %s2039_s11  }
  0x44   : > { %s2134_s2 = smov (%p55_p9, %s2132_s2), 0  ;;  %p220_p11 = scmp.ne.s32.totalorder %s1307_s19, %s1303_s18 }
  0x45   : > { %2040 = sst [smem:[#allocation37_spill]] %s1640_s30  ;;  %s57_s27 = ssub.s32 %s1391_s15, %s2134_s2 }
  0x46   : > { %2041 = sst [smem:[#allocation38_spill]] %s2134_s2  ;;  %s2042_s23 = sadd.s32 4294967294, %s1395_s16  }
  0x47   : > { %p221_p12 = scmp.eq.s32.totalorder %s2042_s23, 31  ;;  %s59_s17 = sor.u32 %s58_s1, %s57_s27 }
  0x48   : > { %s117_s11 = sor.u32 %s1595_s3, %s57_s27  ;;  %s61_s30 = sor.u32 %s1595_s3, %s59_s17 }
  0x49   : > { %p1653_p5 = scmp.eq.s32.totalorder %s117_s11, 0  ;;  %p62_p6 = scmp.eq.s32.totalorder %s61_s30, 0 }
  0x4a   : > { %s145_s9 = sor.u32 %s87_s21, %s57_s27  ;;  %s201_s6 = sor.u32 %s87_s21, %s59_s17 }
  0x4b   : > { %p1657_p9 = scmp.eq.s32.totalorder %s145_s9, 0  ;;  %s2045_s2 = sadd.s32 1, %s1359_s7 }
  0x4c   : > { %s1664_s22 = scalar_select %p62_p6, %s1359_s7, %s2045_s2  }
  0x4d   : > { %p202_p1 = scmp.eq.s32.totalorder %s201_s6, 0  ;;  %p1671_p0 = por %p215_p2, %p214_p10 }
  0x4e   : > { %2046 = sst [smem:[#allocation39_spill]] %s1664_s22  ;;  %p1678_p3 = por %p221_p12, %p220_p11 }
  0x4f   : > { %s2047_s1 = scalar_select %p1671_p0, 1, 0 }
  0x50   : > { %s2048_s3 = scalar_select %p1678_p3, 1, 0 }
  0x51   : > { %s241_s9 = sand.u32 1, %s1359_s7   ;;  %s781_s17 = sshll.u32 %s1387_s14, 1 }
  0x52   : > { %s1684_s30 = scalar_select %p202_p1, %s1311_s20, %s204_s10  }
  0x53   : > { %s780_s21 = sshll.u32 %s241_s9, 3  ;;  %s249_s6 = sadd.s32 %s1379_s12, %s781_s17 }
  0x54   : > { %2049 = sst [smem:[#allocation40_spill]] %s1684_s30  ;;  %s782_s2 = sshll.u32 %s1391_s15, 2 }
  0x55   : > { %s251_s27 = sadd.s32 %s782_s2, %s249_s6  ;;  %s245_s23 = scalar_lea.vmem [#allocation3], %s780_s21 }
  0x56   : > { %s257_s11 = sshll.u32 %s245_s23, 4  ;;  %s783_s10 = sshll.u32 %s251_s27, 3  ;;  %s258_s11 = int_to_ptr.vmem [resolvable:$true] %s257_s11 }
  0x57   : > { %s2050_s0 = sld [smem:[#allocation42_spill]]  ;;  %p2051_p1 = scmp.lt.s32.totalorder %s1395_s16, 32 }
  0x58   : > { %s242_s30 = scalar_lea.sflag [#allocation4], %s241_s9  ;;  %s120_s6 = sadd.s32 1, %s1335_s26 }
  0x59   : > { %p822_p10 = pnand %p2051_p1, %p1603_p13  ;;  %p127_p2 = scmp.ne.s32.totalorder %s1335_s26, %s1331_s25 }
  0x5a   : > { %s1700_s21 = scalar_select %p1653_p5, %s1335_s26, %s120_s6  }
  0x5b   : > { %p133_p11 = scmp.ne.s32.totalorder %s1331_s25, %s1327_s24  ;;  %s2053_s2 = sld [smem:[#allocation19_spill]] }
  0x5c   : > { %2052 = sst [smem:[#allocation41_spill]] %s1700_s21  ;;  %s290_s27 = sand.u32 1, %s1335_s26  }
  0x5d   : > { %s253_s14 = scalar_lea.hbm %s2050_s0, %s783_s10  ;;  %s789_s7 = sshll.u32 %s1391_s15, 5 }
  0x5e   : > { %s255_s17 = sshll.u32 %s253_s14, 4  ;;  %p2054_p12 = scmp.eq.s32.totalorder %s1395_s16, 0  ;;  %s256_s17 = int_to_ptr.hbm [resolvable:$true] %s255_s17 }
  0x5f   : > { %824 = dma.hbm_to_vmem [thread:$0]  (!%p822_p10), %s256_s17, 128, %s258_s11, %s242_s30  }
  0x60   : > { %s2055_s8 = sld [smem:[#allocation18_spill]]  ;;  %p129_p13 = por %p127_p2, %p2054_p12 }
  0x61   : > { %p2056_p6 = scmp.eq.s32.totalorder %s1582_s5, 0  ;;  %s2057_s14 = sld [smem:[#allocation17_spill]] }
  0x62   : > { %s788_s22 = sshll.u32 %s290_s27, 7  ;;  %s296_s24 = sadd.s32 %s1379_s12, %s789_s7 }
  0x63   : > { %p1712_p1 = por %p133_p11, %p2056_p6  ;;  %s790_s9 = sshll.u32 %s296_s24, 3 }
  0x64   : > { %s2059_s11 = sld [smem:[#allocation44_spill]]  ;;  %s292_s17 = scalar_lea.vmem [#allocation8], %s788_s22 }
  0x65   : > { %s301_s6 = sshll.u32 %s292_s17, 4  ;;  %p2060_p5 = scmp.lt.s32.totalorder %s1395_s16, 32  ;;  %s302_s6 = int_to_ptr.vmem [resolvable:$true] %s301_s6 }
  0x66   : > { %s2061_s15 = smov 8   ;;  %s2062_s21 = smov 128  }
  0x67   : > { %p828_p10 = pnand %p2060_p5, %p129_p13  ;;  %s2063_s26 = smov 256  }
  0x68   : > { %s148_s27 = sadd.s32 1, %s2053_s2  ;;  %p155_p2 = scmp.ne.s32.totalorder %s2053_s2, %s2055_s8 }
  0x69   : > { %s1730_s24 = scalar_select %p1657_p9, %s2053_s2, %s148_s27  }
  0x6a   : > { %s298_s10 = scalar_lea.hbm %s2059_s11, %s790_s9  ;;  %p161_p11 = scmp.ne.s32.totalorder %s2055_s8, %s2057_s14 }
  0x6b   : > { %s299_s0 = sshll.u32 %s298_s10, 4  ;;  %s311_s30 = sand.u32 1, %s2053_s2   ;;  %s300_s0 = int_to_ptr.hbm [resolvable:$true] %s299_s0 }
  0x6c   : > { %830 = dma.hbm_to_vmem [thread:$0]  (!%p828_p10), %s300_s0, 2048, %s302_s6, %s1570_s4, %s2063_s26, %s2062_s21, %s2061_s15  }
  0x6d   : > { %s319_s9 = sadd.s32 %s1383_s13, %s789_s7  ;;  %p157_p6 = por %p155_p2, %p2054_p12 }
  0x6e   : > { %p2064_p3 = scmp.eq.s32.totalorder %s1582_s5, 0  ;;  %s791_s23 = sshll.u32 %s311_s30, 7 }
  0x6f   : > { %s793_s11 = sshll.u32 %s319_s9, 3  ;;  %s2066_s4 = sld [smem:[#allocation45_spill]] }
  0x70   : > { %p1742_p0 = por %p161_p11, %p2064_p3  ;;  %s315_s17 = scalar_lea.vmem [#allocation9], %s791_s23 }
  0x71   : > { %s324_s6 = sshll.u32 %s315_s17, 4  ;;  %p2067_p9 = pmov %p2060_p5  ;;  %s325_s6 = int_to_ptr.vmem [resolvable:$true] %s324_s6 }
  0x72   : > { %s312_s2 = scalar_lea.sflag [#allocation10], %s311_s30  ;;  %s2069_s8 = sld [smem:[#allocation23_spill]] (!%p1577_p8) }
  0x73   : > { %p831_p13 = pnand %p2067_p9, %p157_p6  ;;  %342 = sbr.rel (%p1577_p8) target bundleno = 778 (0x30a), region = 40 }
  0x75   : > { %s321_s28 = scalar_lea.hbm %s2066_s4, %s793_s11 }
  0x76   : > { %s322_s27 = sshll.u32 %s321_s28, 4  ;;  %s323_s27 = int_to_ptr.hbm [resolvable:$true] %s322_s27 }
  0x77   : > { %833 = dma.hbm_to_vmem [thread:$0]  (!%p831_p13), %s323_s27, 2048, %s325_s6, %s312_s2, %s2063_s26, %s2062_s21, %s2061_s15  }
  0x78   : > { %s344_s9 = sand.u32 1, %s2069_s8  }
  0x79   : > { %s1757_s10 = sshll.u32 %s344_s9, 3  ;;  %s345_s23 = scalar_lea.sflag [#allocation4], %s344_s9 }
  0x7a   : > { %s348_s11 = scalar_lea.vmem [#allocation3], %s1757_s10 }
  0x7b   : > { %1282 = dma.done.wait (%p1613_p4), %s345_s23, 128  }
  0x7c   : > { %1284 = vsyncadd (%p1613_p4), %s345_s23, 4294967168  ;;  %s2071_s30 = sld [smem:[#allocation21_spill]]  ;;  %s354_s26 = sand.u32 1, %s1582_s5  }
  0x7d   : > { %s355_s4 = scalar_lea.sflag [#allocation7], %s354_s26 }
  0x82   : > { %s356_s15 = sand.u32 1, %s2071_s30  }
  0x83   : > { %s796_s21 = sshll.u32 %s356_s15, 7 }
  0x84   : > { %s1766_s28 = scalar_lea.vmem [#allocation6], %s796_s21 }
  0x85   : > { %1286 = dma.done.wait (%p1625_p7), %s355_s4, 2048  }
  0x86   : > { %1288 = vsyncadd (%p1625_p7), %s355_s4, 4294965248  ;;  %s366_s17 = sand.u32 1, %s1331_s25  }
  0x87   : > { %s797_s6 = sshll.u32 %s366_s17, 7 }
  0x88   : > { %s1773_s27 = scalar_lea.vmem [#allocation8], %s797_s6 }
  0x89   : > { %1290 = dma.done.wait (%p1712_p1), %s355_s4, 2048  }
  0x8a   : > { %1292 = vsyncadd (%p1712_p1), %s355_s4, 4294965248  ;;  %s2073_s5 = sld [smem:[#allocation18_spill]] }
  0x90   : > { %s374_s2 = sand.u32 1, %s2073_s5  }
  0x91   : > { %s798_s7 = sshll.u32 %s374_s2, 7  ;;  %s375_s8 = scalar_lea.sflag [#allocation10], %s374_s2 }
  0x92   : > { %s1780_s14 = scalar_lea.vmem [#allocation9], %s798_s7 }
  0x93   : > { %1294 = dma.done.wait (%p1742_p0), %s375_s8, 2048  }
  0x94   : > { %1296 = vsyncadd (%p1742_p0), %s375_s8, 4294965248  ;;  %s2074_s9 = sld [smem:[#allocation26_spill]]  ;;  %s421_s29 = sand.u32 1, %s1307_s19   ;;  %v444_v0 = vld [vmem:[%s1766_s28 + $0x78] sm:$0xff]  ;;  %v443_v1 = vld [vmem:[%s1766_s28 + $0x70] sm:$0xff] }
  0x95   : > { %s1790_s23 = sshll.u32 %s421_s29, 3  ;;  %s2075_s0 = sld [smem:[#allocation46_spill]]  ;;  %445 = vmatpush.xpose.msra.mxu0 %v444_v0  ;;  %v442_v2 = vld [vmem:[%s1766_s28 + $0x68] sm:$0xff]  ;;  %v441_v3 = vld [vmem:[%s1766_s28 + $0x60] sm:$0xff]  ;;  %v440_v4 = vld [vmem:[%s1766_s28 + $0x58] sm:$0xff] }
  0x96   : > { %v439_v5 = vld [vmem:[%s1766_s28 + $0x50] sm:$0xff]  ;;  %v438_v6 = vld [vmem:[%s1766_s28 + $0x48] sm:$0xff]  ;;  %v437_v7 = vld [vmem:[%s1766_s28 + $0x40] sm:$0xff]  ;;  %s2076_s15 = sld [smem:[#allocation25_spill]]  ;;  %s1819_s21 = scalar_lea.vmem [#allocation11], %s1790_s23 }
  0x97   : > { %v436_v8 = vld [vmem:[%s1766_s28 + $0x38] sm:$0xff]  ;;  %v435_v9 = vld [vmem:[%s1766_s28 + $0x30] sm:$0xff]  ;;  %v434_v10 = vld [vmem:[%s1766_s28 + $0x28] sm:$0xff] }
  0x98   : > { %v433_v11 = vld [vmem:[%s1766_s28 + $0x20] sm:$0xff]  ;;  %v432_v12 = vld [vmem:[%s1766_s28 + $0x18] sm:$0xff]  ;;  %v431_v13 = vld [vmem:[%s1766_s28 + $0x10] sm:$0xff] }
  0x99   : > { %446 = vmatpush.xpose.msra.mxu0 %v443_v1  ;;  %v430_v14 = vld [vmem:[%s1766_s28 + $0x8] sm:$0xff]  ;;  %v429_v15 = vld [vmem:[%s1766_s28] sm:$0xff]  ;;  %v428_v16 = vld [vmem:[%s348_s11] sm:$0xff] }
  0x9a   : > { %p425_p3 = scmp.lt.s32.totalorder %s2074_s9, 1 }
  0x9c   : > { %s2136_s9 = smov (!%p425_p3, %s2074_s9), 1  ;;  %p465_p0 = scmp.eq.s32.totalorder %s2076_s15, 0 }
  0x9d   : > { %s427_s26 = scalar_lea.vmem %s2075_s0, %s2136_s9  ;;  %447 = vmatpush.xpose.msra.mxu0 %v442_v2  ;;  %p800_p8 = scmp.ne.s32.totalorder %s2076_s15, 0 }
  0xa1   : > { %448 = vmatpush.xpose.msra.mxu0 %v441_v3 }
  0xa5   : > { %449 = vmatpush.xpose.msra.mxu0 %v440_v4 }
  0xa9   : > { %450 = vmatpush.xpose.msra.mxu0 %v439_v5 }
  0xad   : > { %451 = vmatpush.xpose.msra.mxu0 %v438_v6 }
  0xb1   : > { %452 = vmatpush.xpose.msra.mxu0 %v437_v7 }
  0xb5   : > { %453 = vmatpush.xpose.msra.mxu0 %v436_v8 }
  0xb9   : > { %454 = vmatpush.xpose.msra.mxu0 %v435_v9 }
  0xbd   : > { %455 = vmatpush.xpose.msra.mxu0 %v434_v10 }
  0xc1   : > { %456 = vmatpush.xpose.msra.mxu0 %v433_v11 }
  0xc5   : > { %457 = vmatpush.xpose.msra.mxu0 %v432_v12 }
  0xc9   : > { %458 = vmatpush.xpose.msra.mxu0 %v431_v13 }
  0xcd   : > { %459 = vmatpush.xpose.msra.mxu0 %v430_v14 }
  0xd1   : > { %460 = vmatpush.xpose.msra.mxu0 %v429_v15 }
  0xd4   : > { %461 = vmatmul.f32.vlgmr.msra.gmra.mxu0 %v428_v16 }
 0x14d   : > { %468 = sbr.rel (%p800_p8) target bundleno = 339 (0x153), region = 60 }
 0x151   : > { %v462_v17 = vpop.f32.mrf.mxu0 }
 0x152   : > { %469 = vst [vmem:[%s1819_s21] sm:$0xff] %v462_v17 }
 0x153 PF: > { %s2077_s4 = sld [smem:[#allocation25_spill]] }
 0x159   : > { %p801_p4 = scmp.le.s32.totalorder %s2077_s4, 0 }
 0x15b   : > { %473 = sbr.rel (%p801_p4) target bundleno = 356 (0x164), region = 64 }
 0x160   : > { %v474_v18 = vld [vmem:[%s1819_s21] sm:$0xff] }
 0x161   : > { %v475_v19 = vadd.f32 %v474_v18, %v462_v17 }
 0x163   : > { %476 = vst [vmem:[%s1819_s21] sm:$0xff] %v475_v19 }
 0x164 PF: > { %s2078_s10 = sld [smem:[#allocation26_spill]] }
 0x16a   : > { %p477_p7 = scmp.eq.s32.totalorder %s2078_s10, 0 }
 0x16c   : > { %p478_p1 = pnand %p477_p7, %p465_p0 }
 0x16e   : > { %481 = sbr.rel (%p478_p1) target bundleno = 373 (0x175), region = 68 }
 0x173   : > { %v1400_v20 = vmov 0.0  }
 0x174   : > { %482 = vst [vmem:[#allocation2] sm:$0xff] %v1400_v20 }
 0x175 PF: > { %s2080_s28 = sld [smem:[#allocation26_spill]] }
 0x17b   : > { %p802_p5 = scmp.ne.s32.totalorder %s2080_s28, 0 }
 0x17d   : > { %485 = sbr.rel (%p802_p5) target bundleno = 579 (0x243), region = 72 }
 0x182   : > { %v501_v21 = vld [vmem:[%s1773_s27 + $0x78] sm:$0xff]  ;;  %v500_v22 = vld [vmem:[%s1773_s27 + $0x70] sm:$0xff]  ;;  %v499_v23 = vld [vmem:[%s1773_s27 + $0x68] sm:$0xff] }
 0x183   : > { %503 = vmatpush.xpose.msra.mxu0 %v501_v21  ;;  %v498_v24 = vld [vmem:[%s1773_s27 + $0x60] sm:$0xff]  ;;  %v497_v25 = vld [vmem:[%s1773_s27 + $0x58] sm:$0xff]  ;;  %v496_v26 = vld [vmem:[%s1773_s27 + $0x50] sm:$0xff] }
 0x184   : > { %v495_v27 = vld [vmem:[%s1773_s27 + $0x48] sm:$0xff]  ;;  %v494_v28 = vld [vmem:[%s1773_s27 + $0x40] sm:$0xff]  ;;  %v493_v29 = vld [vmem:[%s1773_s27 + $0x38] sm:$0xff] }
 0x185   : > { %v492_v30 = vld [vmem:[%s1773_s27 + $0x30] sm:$0xff]  ;;  %v491_v31 = vld [vmem:[%s1773_s27 + $0x28] sm:$0xff]  ;;  %v490_v32 = vld [vmem:[%s1773_s27 + $0x20] sm:$0xff] }
 0x186   : > { %v489_v33 = vld [vmem:[%s1773_s27 + $0x18] sm:$0xff]  ;;  %v488_v34 = vld [vmem:[%s1773_s27 + $0x10] sm:$0xff]  ;;  %v487_v35 = vld [vmem:[%s1773_s27 + $0x8] sm:$0xff] }
 0x187   : > { %504 = vmatpush.xpose.msra.mxu0 %v500_v22  ;;  %v486_v36 = vld [vmem:[%s1773_s27] sm:$0xff]  ;;  %v502_v37 = vld [vmem:[#allocation2] sm:$0xff] }
 0x18b   : > { %505 = vmatpush.xpose.msra.mxu0 %v499_v23 }
 0x18f   : > { %506 = vmatpush.xpose.msra.mxu0 %v498_v24 }
 0x193   : > { %507 = vmatpush.xpose.msra.mxu0 %v497_v25 }
 0x197   : > { %508 = vmatpush.xpose.msra.mxu0 %v496_v26 }
 0x19b   : > { %509 = vmatpush.xpose.msra.mxu0 %v495_v27 }
 0x19f   : > { %510 = vmatpush.xpose.msra.mxu0 %v494_v28 }
 0x1a3   : > { %511 = vmatpush.xpose.msra.mxu0 %v493_v29 }
 0x1a7   : > { %512 = vmatpush.xpose.msra.mxu0 %v492_v30 }
 0x1ab   : > { %513 = vmatpush.xpose.msra.mxu0 %v491_v31 }
 0x1af   : > { %514 = vmatpush.xpose.msra.mxu0 %v490_v32 }
 0x1b3   : > { %515 = vmatpush.xpose.msra.mxu0 %v489_v33 }
 0x1b7   : > { %516 = vmatpush.xpose.msra.mxu0 %v488_v34 }
 0x1bb   : > { %517 = vmatpush.xpose.msra.mxu0 %v487_v35 }
 0x1bf   : > { %518 = vmatpush.xpose.msra.mxu0 %v486_v36 }
 0x1c2   : > { %519 = vmatmul.f32.vlgmr.msra.gmra.mxu0 %v428_v16 }
 0x23f   : > { %v520_v38 = vpop.f32.mrf.mxu0 }
 0x240   : > { %v523_v39 = vadd.f32 %v520_v38, %v502_v37 }
 0x242   : > { %524 = vst [vmem:[#allocation2] sm:$0xff] %v523_v39 }
 0x243 PF: > { %s2081_s17 = sld [smem:[#allocation25_spill]] }
 0x249   : > { %p803_p10 = scmp.ne.s32.totalorder %s2081_s17, 1 }
 0x24b   : > { %528 = sbr.rel (%p803_p10) target bundleno = 753 (0x2f1), region = 76 }
 0x250   : > { %v544_v40 = vld [vmem:[%s1780_s14 + $0x78] sm:$0xff]  ;;  %v543_v41 = vld [vmem:[%s1780_s14 + $0x70] sm:$0xff]  ;;  %v542_v42 = vld [vmem:[%s1780_s14 + $0x68] sm:$0xff] }
 0x251   : > { %546 = vmatpush.msra.mxu0 %v544_v40  ;;  %v541_v43 = vld [vmem:[%s1780_s14 + $0x60] sm:$0xff]  ;;  %v540_v44 = vld [vmem:[%s1780_s14 + $0x58] sm:$0xff]  ;;  %v539_v45 = vld [vmem:[%s1780_s14 + $0x50] sm:$0xff] }
 0x252   : > { %v538_v46 = vld [vmem:[%s1780_s14 + $0x48] sm:$0xff]  ;;  %v537_v47 = vld [vmem:[%s1780_s14 + $0x40] sm:$0xff]  ;;  %v536_v48 = vld [vmem:[%s1780_s14 + $0x38] sm:$0xff] }
 0x253   : > { %547 = vmatpush.msra.mxu0 %v543_v41  ;;  %v535_v49 = vld [vmem:[%s1780_s14 + $0x30] sm:$0xff]  ;;  %v534_v50 = vld [vmem:[%s1780_s14 + $0x28] sm:$0xff]  ;;  %v533_v51 = vld [vmem:[%s1780_s14 + $0x20] sm:$0xff] }
 0x254   : > { %v532_v52 = vld [vmem:[%s1780_s14 + $0x18] sm:$0xff]  ;;  %v531_v53 = vld [vmem:[%s1780_s14 + $0x10] sm:$0xff]  ;;  %v530_v54 = vld [vmem:[%s1780_s14 + $0x8] sm:$0xff] }
 0x255   : > { %548 = vmatpush.msra.mxu0 %v542_v42  ;;  %v529_v55 = vld [vmem:[%s1780_s14] sm:$0xff]  ;;  %v545_v56 = vld [vmem:[#allocation2] sm:$0xff] }
 0x256   : > { %v1036_v57 = vld [vmem:[%s427_s26] ss:$0 sm:$0xff] }
 0x257   : > { %549 = vmatpush.msra.mxu0 %v541_v43  ;;  %v566_v58 = vld [vmem:[%s1819_s21] sm:$0xff] }
 0x258   : > { %v571_v59 = vadd.f32 %v1036_v57, %v566_v58 }
 0x259   : > { %550 = vmatpush.msra.mxu0 %v540_v44 }
 0x25b   : > { %551 = vmatpush.msra.mxu0 %v539_v45 }
 0x25d   : > { %552 = vmatpush.msra.mxu0 %v538_v46 }
 0x25f   : > { %553 = vmatpush.msra.mxu0 %v537_v47 }
 0x261   : > { %554 = vmatpush.msra.mxu0 %v536_v48 }
 0x263   : > { %555 = vmatpush.msra.mxu0 %v535_v49 }
 0x265   : > { %556 = vmatpush.msra.mxu0 %v534_v50 }
 0x267   : > { %557 = vmatpush.msra.mxu0 %v533_v51 }
 0x269   : > { %558 = vmatpush.msra.mxu0 %v532_v52 }
 0x26b   : > { %559 = vmatpush.msra.mxu0 %v531_v53 }
 0x26d   : > { %560 = vmatpush.msra.mxu0 %v530_v54 }
 0x26f   : > { %561 = vmatpush.msra.mxu0 %v529_v55 }
 0x270   : > { %562 = vmatmul.f32.vlgmr.msra.gmra.mxu0 %v545_v56 }
 0x2ed   : > { %v563_v60 = vpop.f32.mrf.mxu0 }
 0x2ee   : > { %v572_v61 = vadd.f32 %v571_v59, %v563_v60 }
 0x2f0   : > { %573 = vst [vmem:[%s1819_s21] sm:$0xff] %v572_v61 }
 0x2f1 PF: > { %s2083_s2 = sld [smem:[#allocation27_spill]]  ;;  %s591_s0 = sshll.u32 %s1819_s21, 4  ;;  %s592_s0 = int_to_ptr.vmem [resolvable:$true] %s591_s0 }
 0x2f2   : > { %s2084_s7 = sld [smem:[#allocation26_spill]]  ;;  %s575_s28 = scalar_lea.sflag [#allocation5], %s421_s29 }
 0x2f3   : > { %s2085_s8 = sld [smem:[#allocation28_spill]]  ;;  %p2087_p11 = scmp.ne.s32.totalorder %s2047_s1, 0 }
 0x2f4   : > { %s2086_s4 = sld [smem:[#allocation47_spill]] }
 0x2f7   : > { %s805_s14 = sshll.u32 %s2083_s2, 1 }
 0x2f8   : > { %s585_s23 = sadd.s32 %s2084_s7, %s805_s14 }
 0x2f9   : > { %s806_s22 = sshll.u32 %s2085_s8, 2 }
 0x2fa   : > { %s587_s30 = sadd.s32 %s806_s22, %s585_s23  ;;  %s1177_s21 = scalar_lea.hbm %s2086_s4, 128 }
 0x2fb   : > { %s807_s15 = sshll.u32 %s587_s30, 3 }
 0x2fc   : > { %s589_s10 = scalar_lea.hbm %s2086_s4, %s807_s15 }
 0x2fd   : > { %s593_s11 = sshll.u32 %s589_s10, 4  ;;  %s594_s11 = int_to_ptr.hbm [resolvable:$true] %s593_s11 }
 0x2fe   : > { %s1171_s17 = sshra.s32 %s594_s11, 4  ;;  %s1172_s17 = int_to_ptr.hbm [resolvable:$true] %s1171_s17 }
 0x2ff   : > { %s1173_s6 = scalar_lea.hbm %s1172_s17, 8  ;;  %p1178_p9 = scmp.lt.s32.totalorder %s1172_s17, %s2086_s4 }
 0x300   : > { %p1174_p2 = scmp.ne.s32.totalorder %s1172_s17, %s1173_s6  ;;  %p1179_p13 = scmp.lt.s32.totalorder %s1177_s21, %s1173_s6 }
 0x302   : > { %p1175_p12 = pnand %p1174_p2, %p2087_p11  ;;  %p1180_p3 = por %p1179_p13, %p1178_p9 }
 0x304   : > { %p1176_p6 = pneg %p1175_p12 }
 0x306   : > { %p1181_p0 = pnand %p1180_p3, %p1176_p6 }
 0x308   : > { %1184 = shalt.err (!%p1181_p0)
}
 0x309   : > { %819 = dma.vmem_to_hbm [thread:$0]  (%p2087_p11), %s592_s0, 128, %s594_s11, %s575_s28  }
 0x30a PF: > { %p839_p8 = scmp.ge.s32.totalorder %s1395_s16, 2  ;;  %s605_s29 = sand.u32 1, %s1303_s18  }
 0x30b   : > { %p2088_p4 = scmp.ne.s32.totalorder %s2048_s3, 0  ;;  %s606_s8 = scalar_lea.sflag [#allocation5], %s605_s29 }
 0x30d   : > { %p835_p7 = pnand %p839_p8, %p2088_p4 }
 0x30f   : > { %p836_p1 = pneg %p835_p7 }
 0x311   : > { %1298 = dma.done.wait (%p836_p1), %s606_s8, 128  }
 0x312   : > { %1300 = vsyncadd (%p836_p1), %s606_s8, 4294967168  ;;  %s27_s16 = sadd.s32 1, %s1395_s16   ;;  %s2090_s1 = sld [smem:[#allocation40_spill]] }
 0x313   : > { %p1894_p5 = scmp.ge.s32.totalorder %s27_s16, 34   ;;  %s2091_s21 = sld [smem:[#allocation18_spill]] }
 0x314   : > { %s2092_s22 = sld [smem:[#allocation19_spill]]  ;;  %s2101_s18 = smov %s1307_s19 }
 0x315   : > { %s2093_s30 = sld [smem:[#allocation20_spill]]  ;;  %s2102_s19 = smov %s1311_s20 }
 0x316   : > { %s2094_s26 = sld [smem:[#allocation41_spill]]  ;;  %s2108_s23 = smov %s1730_s24 }
 0x317   : > { %s2095_s27 = sld [smem:[#allocation21_spill]]  ;;  %s2110_s24 = smov %s1331_s25 }
 0x318   : > { %s2096_s28 = sld [smem:[#allocation22_spill]]  ;;  %s2104_s20 = smov %s2090_s1 }
 0x319   : > { %s2097_s29 = sld [smem:[#allocation37_spill]]  ;;  %s2115_s8 = smov %s1379_s12 }
 0x31a   : > { %s2098_s3 = sld [smem:[#allocation23_spill]]  ;;  %s2116_s9 = smov %s1383_s13 }
 0x31b   : > { %s2099_s6 = sld [smem:[#allocation24_spill]]  ;;  %s2112_s25 = smov %s2093_s30 }
 0x31c   : > { %s2100_s7 = sld [smem:[#allocation39_spill]] }
 0x31d   : > { %s2103_s10 = sld [smem:[#allocation29_spill]] }
 0x31e   : > { %s2105_s11 = sld [smem:[#allocation30_spill]] }
 0x31f   : > { %s2106_s0 = sld [smem:[#allocation32_spill]] }
 0x320   : > { %s2107_s15 = sld [smem:[#allocation33_spill]]  ;;  %s2114_s30 = smov %s2098_s3 }
 0x321   : > { %s2109_s17 = sld [smem:[#allocation36_spill]] }
 0x322   : > { %s2111_s5 = sld [smem:[#allocation38_spill]] }
 0x324   :  { %26 = sbr.rel (!%p1894_p5) target bundleno = 26 (0x1a), region = 145 }
 0x325   : > { %s2117_s12 = smov %s2106_s0 }
 0x326   : > { %s2118_s13 = smov %s2107_s15 }
 0x327   : > { %s2119_s14 = smov %s2109_s17 }
 0x328   : > { %s2120_s15 = smov %s2111_s5 }
 0x329   :  { %612 = vsyncpa [#allocation4], 1 }
 0x32a   :  { %614 = vsyncpa [#allocation4 + $0x1], 1 }
 0x32b   :  { %615 = vsyncpa [#allocation7], 1 }
 0x32c   :  { %617 = vsyncpa [#allocation7 + $0x1], 1 }
 0x32d   :  { %618 = vsyncpa [#allocation10], 1 }
 0x32e   :  { %620 = vsyncpa [#allocation10 + $0x1], 1 }
 0x32f   :  { %621 = vsyncpa [#allocation5], 1 }
 0x330   :  { %623 = vsyncpa [#allocation5 + $0x1], 1 }

</bundles_post_ra>
